<compile_context>
chip_gen: v5e
topology: v5e:2x2
jax: 0.10.0
libtpu: 0.0.40
codegen_flags: <defaults>
</compile_context>

<pallas_src>
import functools
import math

import jax
import jax.numpy as jnp
from jax import lax
from jax.experimental import pallas as pl
from jax.experimental.pallas import tpu as pltpu

_LANE = 128
_MAX_TILE = 2048   # sweep 1024-4096; 2048 keeps per-step VMEM < 1 MB on all gens


# ---------------------------------------------------------------------------
# Kernels
# ---------------------------------------------------------------------------
def _q_block(x, w1, b1, w2, b2, w3, b3):
    """x:(tile,n_in)  W:(out,in)  b1/b2:(out,1)  b3:(1,n_out) -> q:(tile,n_out).

    h1/h2 are kept batch-on-lane ((n_feat, tile)): lane-dense relu/add; the
    final dot_general contracts h2's feature dim so q lands batch-on-sublane,
    matching the (B, n_out) output layout with no explicit transpose.
    """
    h1 = jnp.maximum(
        lax.dot_general(w1, x, (((1,), (1,)), ((), ())),
                        preferred_element_type=jnp.float32) + b1, 0.0)
    h2 = jnp.maximum(
        jnp.dot(w2, h1, preferred_element_type=jnp.float32) + b2, 0.0)
    return lax.dot_general(h2, w3, (((0,), (1,)), ((), ())),
                           preferred_element_type=jnp.float32) + b3


def _mlp_kernel(x_ref, w1_ref, b1_ref, w2_ref, b2_ref, w3_ref, b3_ref, q_ref):
    q = _q_block(x_ref[...], w1_ref[...], b1_ref[...], w2_ref[...],
                 b2_ref[...], w3_ref[...], b3_ref[...])
    q_ref[...] = q.astype(q_ref.dtype)


def _mlp_gather_kernel(x_ref, act_ref, w1_ref, b1_ref, w2_ref, b2_ref,
                       w3_ref, b3_ref, out_ref):
    """Same MLP with the action gather fused: out[b, 0] = q[b, action[b]]."""
    q = _q_block(x_ref[...], w1_ref[...], b1_ref[...], w2_ref[...],
                 b2_ref[...], w3_ref[...], b3_ref[...])            # (tile, n_out)
    col_ids = lax.broadcasted_iota(jnp.int32, q.shape, 1)          # (tile, n_out)
    sel = col_ids == act_ref[...]                                  # (tile, 1) bcast
    out_ref[...] = jnp.sum(jnp.where(sel, q, 0.0), axis=1,
                           keepdims=True).astype(out_ref.dtype)


# ---------------------------------------------------------------------------
# Wrappers
# ---------------------------------------------------------------------------
def _pick_batch_tile(batch):
    """Lane-aligned batch tile.  Single grid step up to _MAX_TILE (pay the
    ~0.35us per-step overhead once; one TC on v5e/v6e, and on v7x splitting
    tiny work across its 2 TCs is a loss).  Larger (training) batches split
    into multiple 'parallel' _MAX_TILE-lane steps."""
    b_pad = pl.cdiv(batch, _LANE) * _LANE
    return min(b_pad, _MAX_TILE)


def _x_spec(tile, n_in):
    # x in natural (B, n_in) layout: one contiguous tile*n_in*4 B DMA per step.
    return pl.BlockSpec((tile, n_in), lambda i: (i, 0))


def _weight_specs(n_in, n_feat, n_out):
    # Grid-invariant weights/biases (constant index_map -> fetched once).
    return [
        pl.BlockSpec((n_feat, n_in), lambda i: (0, 0)),    # W1
        pl.BlockSpec((n_feat, 1), lambda i: (0, 0)),       # b1
        pl.BlockSpec((n_feat, n_feat), lambda i: (0, 0)),  # W2
        pl.BlockSpec((n_feat, 1), lambda i: (0, 0)),       # b2
        pl.BlockSpec((n_out, n_feat), lambda i: (0, 0)),   # W3
        pl.BlockSpec((1, n_out), lambda i: (0, 0)),        # b3 (row vector)
    ]


def _cost(batch, n_in, n_feat, n_out, out_width):
    flops = 2 * batch * (n_in * n_feat + n_feat * n_feat + n_feat * n_out)
    nbytes = 4 * (batch * n_in + batch * out_width
                  + n_feat * (n_in + n_feat + 2) + n_out * (n_feat + 1))
    return pl.CostEstimate(flops=flops, transcendentals=0, bytes_accessed=nbytes)


def _prep_state(state):
    if state.ndim == 3:
        state = jnp.squeeze(state, 1)          # torch.squeeze(state, 1)
    return state.astype(jnp.float32)           # .float()


@functools.partial(jax.jit, static_argnames=("batch_tile",))
def mlp_forward(state, params, batch_tile=None):
    """state: (B, n_input) or (B, 1, n_input).  Returns q: (B, n_output)."""
    x = _prep_state(state)
    w1, b1, w2, b2, w3, b3 = params
    B, n_in = x.shape
    n_feat, n_out = w1.shape[0], w3.shape[0]
    tile = batch_tile if batch_tile is not None else _pick_batch_tile(B)

    return pl.pallas_call(
        _mlp_kernel,
        out_shape=jax.ShapeDtypeStruct((B, n_out), jnp.float32),
        grid_spec=pl.GridSpec(
            grid=(pl.cdiv(B, tile),),
            in_specs=[_x_spec(tile, n_in)] + _weight_specs(n_in, n_feat, n_out),
            out_specs=pl.BlockSpec((tile, n_out), lambda i: (i, 0)),
        ),
        compiler_params=pltpu.CompilerParams(
            dimension_semantics=("parallel",)),
        cost_estimate=_cost(B, n_in, n_feat, n_out, n_out),
    )(x, w1, b1, w2, b2, w3, b3)


@functools.partial(jax.jit, static_argnames=("batch_tile",))
def mlp_gather_forward(state, params, action, batch_tile=None):
    """Fused forward + q.gather(1, action).  Returns (B,) (scalar if B == 1)."""
    x = _prep_state(state)
    w1, b1, w2, b2, w3, b3 = params
    B, n_in = x.shape
    n_feat, n_out = w1.shape[0], w3.shape[0]
    tile = batch_tile if batch_tile is not None else _pick_batch_tile(B)

    act = action.astype(jnp.int32).reshape(B, 1)   # natural (B, 1), no transpose

    out = pl.pallas_call(
        _mlp_gather_kernel,
        out_shape=jax.ShapeDtypeStruct((B, 1), jnp.float32),
        grid_spec=pl.GridSpec(
            grid=(pl.cdiv(B, tile),),
            in_specs=[_x_spec(tile, n_in),
                      pl.BlockSpec((tile, 1), lambda i: (i, 0))]
                     + _weight_specs(n_in, n_feat, n_out),
            out_specs=pl.BlockSpec((tile, 1), lambda i: (i, 0)),
        ),
        compiler_params=pltpu.CompilerParams(
            dimension_semantics=("parallel",)),
        cost_estimate=_cost(B, n_in, n_feat, n_out, 1),
    )(x, act, w1, b1, w2, b2, w3, b3)
    return jnp.squeeze(out)                        # matches torch.squeeze(...)


def network_forward(state, params, action=None, batch_tile=None):
    """Mirrors Network.forward semantics."""
    if action is None:
        return mlp_forward(state, params, batch_tile=batch_tile)
    return mlp_gather_forward(state, params, action, batch_tile=batch_tile)


# ---------------------------------------------------------------------------
# Parameter init (PyTorch (out_features, in_features) weights; b1/b2 as (out,1)
# columns for the batch-on-lane hidden layers, b3 as a (1, n_out) row for the
# batch-on-sublane output layer)
# ---------------------------------------------------------------------------
def _xavier_uniform(key, fan_out, fan_in, gain):
    bound = gain * math.sqrt(6.0 / (fan_in + fan_out))
    return jax.random.uniform(key, (fan_out, fan_in), jnp.float32, -bound, bound)


def init_params(key, n_input, n_features, n_output):
    k1, k2, k3, kb1, kb2, kb3 = jax.random.split(key, 6)
    gain_relu = math.sqrt(2.0)   # nn.init.calculate_gain('relu')
    gain_lin = 1.0               # nn.init.calculate_gain('linear')
    w1 = _xavier_uniform(k1, n_features, n_input, gain_relu)
    w2 = _xavier_uniform(k2, n_features, n_features, gain_relu)
    w3 = _xavier_uniform(k3, n_output, n_features, gain_lin)
    # torch.nn.Linear default bias init: U(-1/sqrt(fan_in), 1/sqrt(fan_in))
    b1 = jax.random.uniform(kb1, (n_features, 1), jnp.float32,
                            -1.0 / math.sqrt(n_input), 1.0 / math.sqrt(n_input))
    b2 = jax.random.uniform(kb2, (n_features, 1), jnp.float32,
                            -1.0 / math.sqrt(n_features), 1.0 / math.sqrt(n_features))
    b3 = jax.random.uniform(kb3, (1, n_output), jnp.float32,
                            -1.0 / math.sqrt(n_features), 1.0 / math.sqrt(n_features))
    return (w1, b1, w2, b2, w3, b3)


if __name__ == "__main__":
    key = jax.random.PRNGKey(0)

    # Acrobot-like shapes: obs dim 6, 3 discrete actions, 32 hidden features.
    # batch=200 is deliberately NOT a multiple of 128: the single 256-lane grid
    # step exercises Pallas padding (padded rows compute discarded garbage; the
    # masked output write drops them), covering the review's padding concern.
    batch, n_input, n_features, n_output = 200, 6, 32, 3

    k_param, k_state, k_act = jax.random.split(key, 3)
    params = init_params(k_param, n_input, n_features, n_output)

    # state with a singleton dim-1, as the module expects torch.squeeze(state, 1)
    state = jax.random.normal(k_state, (batch, 1, n_input), jnp.float32)
    action = jax.random.randint(k_act, (batch, 1), 0, n_output)

    # Pure-JAX reference.
    w1, b1, w2, b2, w3, b3 = params
    xs = jnp.squeeze(state, 1)
    ref_q = jnp.maximum(xs @ w1.T + b1.T, 0.0)
    ref_q = jnp.maximum(ref_q @ w2.T + b2.T, 0.0)
    ref_q = ref_q @ w3.T + b3
    ref_q_acted = jnp.squeeze(jnp.take_along_axis(ref_q, action, axis=1))

    q = network_forward(state, params)                 # action is None -> q values
    q_acted = network_forward(state, params, action)   # fused gathered q values
    jax.block_until_ready((q, q_acted))

    assert q.shape == (batch, n_output), q.shape
    assert q_acted.shape == (batch,), q_acted.shape
    assert jnp.allclose(q, ref_q, atol=1e-5, rtol=1e-5)
    assert jnp.allclose(q_acted, ref_q_acted, atol=1e-5, rtol=1e-5)
    print("KERNEL_OK")
</pallas_src>

<mosaic_0001>
module attributes {stable_mosaic.version = 11 : i64} {
  func.func @_mlp_kernel(%arg0: i32, %arg1: memref<256x6xf32, #tpu.memory_space<vmem>>, %arg2: memref<32x6xf32, #tpu.memory_space<vmem>>, %arg3: memref<32x1xf32, #tpu.memory_space<vmem>>, %arg4: memref<32x32xf32, #tpu.memory_space<vmem>>, %arg5: memref<32x1xf32, #tpu.memory_space<vmem>>, %arg6: memref<3x32xf32, #tpu.memory_space<vmem>>, %arg7: memref<1x3xf32, #tpu.memory_space<vmem>>, %arg8: memref<256x3xf32, #tpu.memory_space<vmem>>) attributes {dimension_semantics = [#tpu.dimension_semantics<parallel>], iteration_bounds = array<i64: 1>, scalar_prefetch = 0 : i64, scratch_operands = 0 : i64, tpu.core_type = #tpu.core_type<tc>, window_params = [{transform_indices = @transform_0, window_bounds = array<i64: 256, 6>}, {pipeline_mode = #tpu.pipeline_mode<synchronous>, transform_indices = @transform_1, window_bounds = array<i64: 32, 6>}, {pipeline_mode = #tpu.pipeline_mode<synchronous>, transform_indices = @transform_2, window_bounds = array<i64: 32, 1>}, {pipeline_mode = #tpu.pipeline_mode<synchronous>, transform_indices = @transform_3, window_bounds = array<i64: 32, 32>}, {pipeline_mode = #tpu.pipeline_mode<synchronous>, transform_indices = @transform_4, window_bounds = array<i64: 32, 1>}, {pipeline_mode = #tpu.pipeline_mode<synchronous>, transform_indices = @transform_5, window_bounds = array<i64: 3, 32>}, {pipeline_mode = #tpu.pipeline_mode<synchronous>, transform_indices = @transform_6, window_bounds = array<i64: 1, 3>}, {transform_indices = @transform_7, window_bounds = array<i64: 256, 3>}]} {
    %c0 = arith.constant 0 : index
    %c0_0 = arith.constant 0 : index
    %0 = vector.load %arg1[%c0, %c0_0] : memref<256x6xf32, #tpu.memory_space<vmem>>, vector<256x6xf32>
    %c0_1 = arith.constant 0 : index
    %c0_2 = arith.constant 0 : index
    %1 = vector.load %arg2[%c0_1, %c0_2] : memref<32x6xf32, #tpu.memory_space<vmem>>, vector<32x6xf32>
    %c0_3 = arith.constant 0 : index
    %c0_4 = arith.constant 0 : index
    %2 = vector.load %arg3[%c0_3, %c0_4] : memref<32x1xf32, #tpu.memory_space<vmem>>, vector<32x1xf32>
    %c0_5 = arith.constant 0 : index
    %c0_6 = arith.constant 0 : index
    %3 = vector.load %arg4[%c0_5, %c0_6] : memref<32x32xf32, #tpu.memory_space<vmem>>, vector<32x32xf32>
    %c0_7 = arith.constant 0 : index
    %c0_8 = arith.constant 0 : index
    %4 = vector.load %arg5[%c0_7, %c0_8] : memref<32x1xf32, #tpu.memory_space<vmem>>, vector<32x1xf32>
    %c0_9 = arith.constant 0 : index
    %c0_10 = arith.constant 0 : index
    %5 = vector.load %arg6[%c0_9, %c0_10] : memref<3x32xf32, #tpu.memory_space<vmem>>, vector<3x32xf32>
    %c0_11 = arith.constant 0 : index
    %c0_12 = arith.constant 0 : index
    %6 = vector.load %arg7[%c0_11, %c0_12] : memref<1x3xf32, #tpu.memory_space<vmem>>, vector<1x3xf32>
    %cst = arith.constant dense<0.000000e+00> : vector<32x256xf32>
    %7 = tpu.matmul %1, %0, %cst {dimension_numbers = #tpu.dot_dimension_numbers<[1], [1], [0], [0], [0, 0, 1, 0], [], []>} : vector<32x6xf32>, vector<256x6xf32>, vector<32x256xf32> -> vector<32x256xf32>
    %8 = vector.broadcast %2 : vector<32x1xf32> to vector<32x256xf32>
    %9 = arith.addf %7, %8 : vector<32x256xf32>
    %cst_13 = arith.constant 0.000000e+00 : f32
    %10 = vector.broadcast %cst_13 : f32 to vector<32x256xf32>
    %11 = arith.maximumf %9, %10 : vector<32x256xf32>
    %cst_14 = arith.constant dense<0.000000e+00> : vector<32x256xf32>
    %12 = tpu.matmul %3, %11, %cst_14 {dimension_numbers = #tpu.dot_dimension_numbers<[1], [0], [0], [1], [0, 0, 1, 1], [], []>} : vector<32x32xf32>, vector<32x256xf32>, vector<32x256xf32> -> vector<32x256xf32>
    %13 = vector.broadcast %4 : vector<32x1xf32> to vector<32x256xf32>
    %14 = arith.addf %12, %13 : vector<32x256xf32>
    %cst_15 = arith.constant 0.000000e+00 : f32
    %15 = vector.broadcast %cst_15 : f32 to vector<32x256xf32>
    %16 = arith.maximumf %14, %15 : vector<32x256xf32>
    %cst_16 = arith.constant dense<0.000000e+00> : vector<256x3xf32>
    %17 = tpu.matmul %16, %5, %cst_16 {dimension_numbers = #tpu.dot_dimension_numbers<[0], [1], [1], [0], [0, 1, 1, 0], [], []>} : vector<32x256xf32>, vector<3x32xf32>, vector<256x3xf32> -> vector<256x3xf32>
    %18 = vector.broadcast %6 : vector<1x3xf32> to vector<256x3xf32>
    %19 = arith.addf %17, %18 : vector<256x3xf32>
    %c0_17 = arith.constant 0 : index
    %c0_18 = arith.constant 0 : index
    %20 = vector.load %arg8[%c0_17, %c0_18] : memref<256x3xf32, #tpu.memory_space<vmem>>, vector<256x3xf32>
    tpu.vector_store %arg8[%c0_17, %c0_18], %19 {strides = array<i32>} : memref<256x3xf32, #tpu.memory_space<vmem>>, vector<256x3xf32>,
    return
  }
  func.func @transform_0(%arg0: i32) -> (i32, i32) {
    %c0_i32 = arith.constant 0 : i32
    %c0_i32_0 = arith.constant 0 : i32
    return %arg0, %c0_i32 : i32, i32
  }
  func.func @transform_1(%arg0: i32) -> (i32, i32) {
    %c0_i32 = arith.constant 0 : i32
    %c0_i32_0 = arith.constant 0 : i32
    %c0_i32_1 = arith.constant 0 : i32
    return %c0_i32, %c0_i32_0 : i32, i32
  }
  func.func @transform_2(%arg0: i32) -> (i32, i32) {
    %c0_i32 = arith.constant 0 : i32
    %c0_i32_0 = arith.constant 0 : i32
    %c0_i32_1 = arith.constant 0 : i32
    return %c0_i32, %c0_i32_0 : i32, i32
  }
  func.func @transform_3(%arg0: i32) -> (i32, i32) {
    %c0_i32 = arith.constant 0 : i32
    %c0_i32_0 = arith.constant 0 : i32
    %c0_i32_1 = arith.constant 0 : i32
    return %c0_i32, %c0_i32_0 : i32, i32
  }
  func.func @transform_4(%arg0: i32) -> (i32, i32) {
    %c0_i32 = arith.constant 0 : i32
    %c0_i32_0 = arith.constant 0 : i32
    %c0_i32_1 = arith.constant 0 : i32
    return %c0_i32, %c0_i32_0 : i32, i32
  }
  func.func @transform_5(%arg0: i32) -> (i32, i32) {
    %c0_i32 = arith.constant 0 : i32
    %c0_i32_0 = arith.constant 0 : i32
    %c0_i32_1 = arith.constant 0 : i32
    return %c0_i32, %c0_i32_0 : i32, i32
  }
  func.func @transform_6(%arg0: i32) -> (i32, i32) {
    %c0_i32 = arith.constant 0 : i32
    %c0_i32_0 = arith.constant 0 : i32
    %c0_i32_1 = arith.constant 0 : i32
    return %c0_i32, %c0_i32_0 : i32, i32
  }
  func.func @transform_7(%arg0: i32) -> (i32, i32) {
    %c0_i32 = arith.constant 0 : i32
    %c0_i32_0 = arith.constant 0 : i32
    return %arg0, %c0_i32 : i32, i32
  }
}

</mosaic_0001>

<bundles_post_ra>
// kernel: mlp_forward.1
= control target key start
LH: loop header
LB: loop body
LE: loop exit
PB: predicated region body
PF: predicated region fallthrough
CT: control target
= control target key end

     0   :  { %vm96_vm0 = vcmask 48128   ;;  %v909_v21 = vmov 0   ;;  %vm291_vm1 = vcmask 261120   ;;  %vm649_vm2 = vcmask 23552   ;;  %s1320_s0 = inlined_call_operand.vmem [shape: f32[200,6], index: 0, kind: input, shape index: {}]   ;;  %s1321_s1 = inlined_call_operand.vmem [shape: f32[32,6], index: 1, kind: input, shape index: {}]   ;;  %s1322_s2 = inlined_call_operand.vmem [shape: f32[32,1], index: 2, kind: input, shape index: {}]   ;;  %s1323_s3 = inlined_call_operand.vmem [shape: f32[32,32], index: 3, kind: input, shape index: {}]   ;;  %s1324_s4 = inlined_call_operand.vmem [shape: f32[32,1], index: 4, kind: input, shape index: {}]   ;;  %s1325_s5 = inlined_call_operand.vmem [shape: f32[3,32], index: 5, kind: input, shape index: {}]   ;;  %s1326_s6 = inlined_call_operand.vmem [shape: f32[1,3], index: 6, kind: input, shape index: {}]   ;;  %s1327_s7 = inlined_call_operand.vmem [shape: f32[200,3], index: 7, kind: output, shape index: {}]  }
   0x1   :  { %v41_v0 = vld [vmem:[%s1320_s0 + $0x78] sm:$0xff]  ;;  %v40_v2 = vld [vmem:[%s1320_s0 + $0x70] sm:$0xff]  ;;  %v39_v4 = vld [vmem:[%s1320_s0 + $0x68] sm:$0xff]  ;;  %906 = vset.pattern.permute.xlu1 %v909_v21  ;;  %905 = vset.pattern.permute.xlu0 %v909_v21 }
   0x2   :  { %v57_v1 = vld [vmem:[%s1320_s0 + $0xf8] sm:$0xff]  ;;  %819 = vmatpush.xpose.msk.msra.mxu0 %vm96_vm0, %v41_v0  ;;  %v56_v3 = vld [vmem:[%s1320_s0 + $0xf0] sm:$0xff]  ;;  %v55_v5 = vld [vmem:[%s1320_s0 + $0xe8] sm:$0xff]  ;;  %907 = vset.pattern.permute.xlu2 %v909_v21 }
   0x3   :  { %839 = vmatpush.xpose.msk.msra.mxu1 %vm96_vm0, %v57_v1  ;;  %v38_v6 = vld [vmem:[%s1320_s0 + $0x60] sm:$0xff]  ;;  %v37_v8 = vld [vmem:[%s1320_s0 + $0x58] sm:$0xff]  ;;  %v36_v10 = vld [vmem:[%s1320_s0 + $0x50] sm:$0xff] }
   0x4   :  { %v54_v7 = vld [vmem:[%s1320_s0 + $0xe0] sm:$0xff]  ;;  %v53_v9 = vld [vmem:[%s1320_s0 + $0xd8] sm:$0xff]  ;;  %v52_v11 = vld [vmem:[%s1320_s0 + $0xd0] sm:$0xff] }
   0x5   :  { %v35_v12 = vld [vmem:[%s1320_s0 + $0x48] sm:$0xff]  ;;  %v34_v14 = vld [vmem:[%s1320_s0 + $0x40] sm:$0xff]  ;;  %v33_v16 = vld [vmem:[%s1320_s0 + $0x38] sm:$0xff] }
   0x6   :  { %820 = vmatpush.xpose.msk.msra.mxu0 %vm96_vm0, %v40_v2  ;;  %v51_v13 = vld [vmem:[%s1320_s0 + $0xc8] sm:$0xff]  ;;  %v50_v15 = vld [vmem:[%s1320_s0 + $0xc0] sm:$0xff]  ;;  %v49_v17 = vld [vmem:[%s1320_s0 + $0xb8] sm:$0xff] }
   0x7   :  { %840 = vmatpush.xpose.msk.msra.mxu1 %vm96_vm0, %v56_v3  ;;  %v63_v18 = vld [vmem:[%s1322_s2 + $0x8] sm:$0xff]  ;;  %v32_v19 = vld [vmem:[%s1320_s0 + $0x30] sm:$0xff]  ;;  %v62_v24 = vld [vmem:[%s1322_s2] sm:$0xff] }
   0x8   :  { %v48_v20 = vld [vmem:[%s1320_s0 + $0xb0] sm:$0xff]  ;;  %83 = vperm.xlu1 %906, %v63_v18   ;;  %v31_v22 = vld [vmem:[%s1320_s0 + $0x28] sm:$0xff]  ;;  %v65_v25 = vld [vmem:[%s1322_s2 + $0x18] sm:$0xff] }
   0x9   :  { %v47_v23 = vld [vmem:[%s1320_s0 + $0xa8] sm:$0xff]  ;;  %v30_v26 = vld [vmem:[%s1320_s0 + $0x20] sm:$0xff]  ;;  %93 = vperm.xlu0 %905, %v65_v25   ;;  %v29_v28 = vld [vmem:[%s1320_s0 + $0x18] sm:$0xff] }
   0xa   :  { %821 = vmatpush.xpose.msk.msra.mxu0 %vm96_vm0, %v39_v4  ;;  %v46_v27 = vld [vmem:[%s1320_s0 + $0xa0] sm:$0xff]  ;;  %v45_v29 = vld [vmem:[%s1320_s0 + $0x98] sm:$0xff]  ;;  %v64_v30 = vld [vmem:[%s1322_s2 + $0x10] sm:$0xff] }
   0xb   :  { %841 = vmatpush.xpose.msk.msra.mxu1 %vm96_vm0, %v55_v5  ;;  %v28_v31 = vld [vmem:[%s1320_s0 + $0x10] sm:$0xff]  ;;  %v27_v33 = vld [vmem:[%s1320_s0 + $0x8] sm:$0xff]  ;;  %v73_v36 = vld [vmem:[%s1324_s4 + $0x18] sm:$0xff] }
   0xc   :  { %v44_v32 = vld [vmem:[%s1320_s0 + $0x90] sm:$0xff]  ;;  %v43_v34 = vld [vmem:[%s1320_s0 + $0x88] sm:$0xff]  ;;  %v26_v37 = vld [vmem:[%s1320_s0] sm:$0xff] }
   0xd   :  { %v72_v35 = vld [vmem:[%s1324_s4 + $0x10] sm:$0xff]  ;;  %v42_v38 = vld [vmem:[%s1320_s0 + $0x80] sm:$0xff]  ;;  %v59_v40 = vld [vmem:[%s1321_s1 + $0x8] sm:$0xff] }
   0xe   :  { %822 = vmatpush.xpose.msk.msra.mxu0 %vm96_vm0, %v38_v6  ;;  %v58_v39 = vld [vmem:[%s1321_s1] sm:$0xff]  ;;  %v60_v41 = vld [vmem:[%s1321_s1 + $0x10] sm:$0xff]  ;;  %v61_v42 = vld [vmem:[%s1321_s1 + $0x18] sm:$0xff] }
   0xf   :  { %842 = vmatpush.xpose.msk.msra.mxu1 %vm96_vm0, %v54_v7  ;;  %v70_v63 = vld [vmem:[%s1324_s4] sm:$0xff] }
  0x10   :  { %78 = vperm.xlu1 %906, %v62_v24   ;;  %273 = vperm.xlu2 %907, %v70_v63  }
  0x11   :  { %88 = vperm.xlu0 %905, %v64_v30  }
  0x12   :  { %823 = vmatpush.xpose.msk.msra.mxu0 %vm96_vm0, %v37_v8  ;;  %v66_v8 = vld [vmem:[%s1323_s3] sm:$0xff] }
  0x13   :  { %843 = vmatpush.xpose.msk.msra.mxu1 %vm96_vm0, %v53_v9  ;;  %v71_v9 = vld [vmem:[%s1324_s4 + $0x8] sm:$0xff] }
  0x16   :  { %824 = vmatpush.xpose.msk.msra.mxu0 %vm96_vm0, %v36_v10  ;;  %v67_v10 = vld [vmem:[%s1323_s3 + $0x8] sm:$0xff] }
  0x17   :  { %844 = vmatpush.xpose.msk.msra.mxu1 %vm96_vm0, %v52_v11  ;;  %v68_v11 = vld [vmem:[%s1323_s3 + $0x10] sm:$0xff] }
  0x18   :  { %288 = vperm.xlu1 %906, %v73_v36   ;;  %278 = vperm.xlu2 %907, %v71_v9  }
  0x19   :  { %283 = vperm.xlu0 %905, %v72_v35  }
  0x1a   :  { %825 = vmatpush.xpose.msk.msra.mxu0 %vm96_vm0, %v35_v12  ;;  %v69_v12 = vld [vmem:[%s1323_s3 + $0x18] sm:$0xff] }
  0x1b   :  { %845 = vmatpush.xpose.msk.msra.mxu1 %vm96_vm0, %v51_v13 }
  0x1e   :  { %826 = vmatpush.xpose.msk.msra.mxu0 %vm96_vm0, %v34_v14  ;;  %v74_v14 = vld [vmem:[%s1325_s5] sm:$0x7] }
  0x1f   :  { %846 = vmatpush.xpose.msk.msra.mxu1 %vm96_vm0, %v50_v15 }
  0x22   :  { %827 = vmatpush.xpose.msk.msra.mxu0 %vm96_vm0, %v33_v16 }
  0x23   :  { %847 = vmatpush.xpose.msk.msra.mxu1 %vm96_vm0, %v49_v17 }
  0x26   :  { %828 = vmatpush.xpose.msk.msra.mxu0 %vm96_vm0, %v32_v19 }
  0x27   :  { %848 = vmatpush.xpose.msk.msra.mxu1 %vm96_vm0, %v48_v20 }
  0x2a   :  { %829 = vmatpush.xpose.msk.msra.mxu0 %vm96_vm0, %v31_v22 }
  0x2b   :  { %849 = vmatpush.xpose.msk.msra.mxu1 %vm96_vm0, %v47_v23 }
  0x2e   :  { %830 = vmatpush.xpose.msk.msra.mxu0 %vm96_vm0, %v30_v26 }
  0x2f   :  { %850 = vmatpush.xpose.msk.msra.mxu1 %vm96_vm0, %v46_v27 }
  0x32   :  { %831 = vmatpush.xpose.msk.msra.mxu0 %vm96_vm0, %v29_v28 }
  0x33   :  { %851 = vmatpush.xpose.msk.msra.mxu1 %vm96_vm0, %v45_v29 }
  0x36   :  { %832 = vmatpush.xpose.msk.msra.mxu0 %vm96_vm0, %v28_v31 }
  0x37   :  { %852 = vmatpush.xpose.msk.msra.mxu1 %vm96_vm0, %v44_v32 }
  0x3a   :  { %833 = vmatpush.xpose.msk.msra.mxu0 %vm96_vm0, %v27_v33 }
  0x3b   :  { %853 = vmatpush.xpose.msk.msra.mxu1 %vm96_vm0, %v43_v34 }
  0x3e   :  { %834 = vmatpush.xpose.msk.msra.mxu0 %vm96_vm0, %v26_v37 }
  0x3f   :  { %854 = vmatpush.xpose.msk.msra.mxu1 %vm96_vm0, %v42_v38 }
  0x41   :  { %835 = vmatmul.msk.f32.vlgmr.msra.gmra.mxu0 %vm96_vm0, %v58_v39 }
  0x42   :  { %855 = vmatmul.msk.f32.vlgmr.msra.gmra.mxu1 %vm96_vm0, %v58_v39  ;;  %867 = vmatpush.xpose.msk.msrb.mxu0 %vm291_vm1, %v74_v14 }
  0x43   :  { %900 = vmatpush.xpose.msk.msrb.mxu1 %vm291_vm1, %v74_v14 }
  0x49   :  { %836 = vmatmul.msk.f32.gmra.mxu0 %vm96_vm0, %v59_v40 }
  0x4a   :  { %856 = vmatmul.msk.f32.gmra.mxu1 %vm96_vm0, %v59_v40 }
  0x51   :  { %837 = vmatmul.msk.f32.gmra.mxu0 %vm96_vm0, %v60_v41 }
  0x52   :  { %857 = vmatmul.msk.f32.gmra.mxu1 %vm96_vm0, %v60_v41 }
  0x59   :  { %838 = vmatmul.msk.f32.gmra.mxu0 %vm96_vm0, %v61_v42 }
  0x5a   :  { %858 = vmatmul.msk.f32.gmra.mxu1 %vm96_vm0, %v61_v42 }
  0x6a   :  { %v274_v13 = vpop.permute.xlu2 %273 }
  0x72   :  { %v279_v21 = vpop.permute.xlu2 %278 }
  0x7a   :  { %v84_v48 = vpop.permute.xlu1 %83 }
  0x7b   :  { %v94_v47 = vpop.permute.xlu0 %93 }
  0x82   :  { %v79_v58 = vpop.permute.xlu1 %78 }
  0x83   :  { %v89_v51 = vpop.permute.xlu0 %88 }
  0x8a   :  { %v289_v35 = vpop.permute.xlu1 %288 }
  0x8b   :  { %v284_v28 = vpop.permute.xlu0 %283 }
  0xbe   :  { %v222_v43 = vpop.f32.mrf.mxu0 }
  0xbf   :  { %v251_v44 = vpop.f32.mrf.mxu1  ;;  %v223_v0 = vadd.f32 %v222_v43, %v79_v58 }
  0xc0   :  { %v252_v1 = vadd.f32 %v251_v44, %v79_v58 }
  0xc1   :  { %v263_v6 = vmax.f32 %v223_v0, 0.0 }
  0xc2   :  { %v264_v7 = vmax.f32 %v252_v1, 0.0 }
  0xc6   :  { %v225_v45 = vpop.f32.mrf.mxu0 }
  0xc7   :  { %v254_v46 = vpop.f32.mrf.mxu1  ;;  %v226_v59 = vadd.f32 %v225_v45, %v84_v48 }
  0xc8   :  { %v255_v60 = vadd.f32 %v254_v46, %v84_v48 }
  0xc9   :  { %v265_v4 = vmax.f32 %v226_v59, 0.0 }
  0xca   :  { %v266_v5 = vmax.f32 %v255_v60, 0.0 }
  0xce   :  { %v228_v49 = vpop.f32.mrf.mxu0 }
  0xcf   :  { %v257_v50 = vpop.f32.mrf.mxu1  ;;  %v229_v54 = vadd.f32 %v228_v49, %v89_v51 }
  0xd0   :  { %v258_v55 = vadd.f32 %v257_v50, %v89_v51 }
  0xd1   :  { %v267_v2 = vmax.f32 %v229_v54, 0.0 }
  0xd2   :  { %v268_v3 = vmax.f32 %v258_v55, 0.0 }
  0xd6   :  { %v231_v52 = vpop.f32.mrf.mxu0 }
  0xd7   :  { %v260_v53 = vpop.f32.mrf.mxu1  ;;  %v232_v56 = vadd.f32 %v231_v52, %v94_v47 }
  0xd8   :  { %v261_v57 = vadd.f32 %v260_v53, %v94_v47 }
  0xd9   :  { %v269_v61 = vmax.f32 %v232_v56, 0.0 }
  0xda   :  { %v270_v62 = vmax.f32 %v261_v57, 0.0 }
  0xdb   :  { %316 = vmatpush.msra.mxu2 %v269_v61 }
  0xdc   :  { %345 = vmatpush.msra.mxu3 %v270_v62 }
  0xdd   :  { %317 = vmatpush.msra.mxu2 %v267_v2 }
  0xde   :  { %346 = vmatpush.msra.mxu3 %v268_v3 }
  0xdf   :  { %318 = vmatpush.msra.mxu2 %v265_v4 }
  0xe0   :  { %347 = vmatpush.msra.mxu3 %v266_v5 }
  0xe1   :  { %319 = vmatpush.msra.mxu2 %v263_v6 }
  0xe2   :  { %348 = vmatpush.msra.mxu3 %v264_v7  ;;  %859 = vmatmul.msk.f32.vlgmr.msra.gmra.mxu2 %vm291_vm1, %v66_v8 }
  0xe3   :  { %863 = vmatmul.msk.f32.vlgmr.msra.gmra.mxu3 %vm291_vm1, %v66_v8  ;;  %901 = vmatpush.xpose.msk.msrb.mxu2 %vm291_vm1, %v74_v14  ;;  %v1184_v8 = vld [vmem:[%s1326_s6] ss:$0 sm:$0xff] }
  0xe4   :  { %902 = vmatpush.xpose.msk.msrb.mxu3 %vm291_vm1, %v74_v14 }
  0xea   :  { %860 = vmatmul.msk.f32.gmra.mxu2 %vm291_vm1, %v67_v10 }
  0xeb   :  { %864 = vmatmul.msk.f32.gmra.mxu3 %vm291_vm1, %v67_v10 }
  0xf2   :  { %861 = vmatmul.msk.f32.gmra.mxu2 %vm291_vm1, %v68_v11 }
  0xf3   :  { %865 = vmatmul.msk.f32.gmra.mxu3 %vm291_vm1, %v68_v11 }
  0xfa   :  { %862 = vmatmul.msk.f32.gmra.mxu2 %vm291_vm1, %v69_v12 }
  0xfb   :  { %866 = vmatmul.msk.f32.gmra.mxu3 %vm291_vm1, %v69_v12 }
 0x165   :  { %v321_v15 = vpop.f32.mrf.mxu2 }
 0x166   :  { %v350_v16 = vpop.f32.mrf.mxu3  ;;  %v322_v17 = vadd.f32 %v321_v15, %v274_v13 }
 0x167   :  { %v351_v18 = vadd.f32 %v350_v16, %v274_v13 }
 0x168   :  { %v362_v19 = vmax.f32 %v322_v17, 0.0 }
 0x169   :  { %v363_v20 = vmax.f32 %v351_v18, 0.0 }
 0x16a   :  { %373 = vxpose.xlu2.b32.start [1/4] (short) %v362_v19, 128 }
 0x16b   :  { %405 = vxpose.xlu0.b32.start [1/4] (short) %v363_v20, 128 }
 0x16d   :  { %v324_v22 = vpop.f32.mrf.mxu2 }
 0x16e   :  { %v353_v23 = vpop.f32.mrf.mxu3  ;;  %v325_v24 = vadd.f32 %v324_v22, %v279_v21 }
 0x16f   :  { %v354_v25 = vadd.f32 %v353_v23, %v279_v21 }
 0x170   :  { %v364_v26 = vmax.f32 %v325_v24, 0.0 }
 0x171   :  { %v365_v27 = vmax.f32 %v354_v25, 0.0 }
 0x172   :  { %374 = vxpose.xlu2.b32.cont [2/4] (short) %v364_v26, 128 }
 0x173   :  { %406 = vxpose.xlu0.b32.cont [2/4] (short) %v365_v27, 128 }
 0x175   :  { %v327_v29 = vpop.f32.mrf.mxu2 }
 0x176   :  { %v356_v30 = vpop.f32.mrf.mxu3  ;;  %v328_v31 = vadd.f32 %v327_v29, %v284_v28 }
 0x177   :  { %v357_v32 = vadd.f32 %v356_v30, %v284_v28 }
 0x178   :  { %v366_v33 = vmax.f32 %v328_v31, 0.0 }
 0x179   :  { %v367_v34 = vmax.f32 %v357_v32, 0.0 }
 0x17a   :  { %375 = vxpose.xlu2.b32.cont [3/4] (short) %v366_v33, 128 }
 0x17b   :  { %407 = vxpose.xlu0.b32.cont [3/4] (short) %v367_v34, 128 }
 0x17d   :  { %v330_v36 = vpop.f32.mrf.mxu2 }
 0x17e   :  { %v359_v37 = vpop.f32.mrf.mxu3  ;;  %v331_v38 = vadd.f32 %v330_v36, %v289_v35 }
 0x17f   :  { %v360_v39 = vadd.f32 %v359_v37, %v289_v35 }
 0x180   :  { %v368_v40 = vmax.f32 %v331_v38, 0.0 }
 0x181   :  { %v369_v41 = vmax.f32 %v360_v39, 0.0 }
 0x182   :  { %376 = vxpose.xlu2.b32.end [4/4] (short) %v368_v40, 128 }
 0x183   :  { %408 = vxpose.xlu0.b32.end [4/4] (short) %v369_v41, 128 }
 0x203   :  { %v389_v42 = vpop.trf.xlu2 }
 0x204   :  { %868 = vmatmul.msk.f32.vlgmr.msrb.gmra.mxu0 %vm291_vm1, %v389_v42 }
 0x20b   :  { %v390_v43 = vpop.trf.xlu2 }
 0x20c   :  { %869 = vmatmul.msk.f32.gmra.mxu0 %vm291_vm1, %v390_v43 }
 0x20f   :  { %v421_v44 = vpop.trf.xlu0 }
 0x213   :  { %v391_v45 = vpop.trf.xlu2 }
 0x214   :  { %870 = vmatmul.msk.f32.gmra.mxu0 %vm291_vm1, %v391_v45 }
 0x217   :  { %v1152_v46 = vpop.trf.xlu0 }
 0x21b   :  { %v392_v47 = vpop.trf.xlu2 }
 0x21c   :  { %871 = vmatmul.msk.f32.gmra.mxu0 %vm291_vm1, %v392_v47 }
 0x21f   :  { %v1155_v48 = vpop.trf.xlu0 }
 0x223   :  { %v393_v49 = vpop.trf.xlu2 }
 0x224   :  { %872 = vmatmul.msk.f32.gmra.mxu0 %vm291_vm1, %v393_v49 }
 0x227   :  { %v1158_v50 = vpop.trf.xlu0 }
 0x22b   :  { %v394_v51 = vpop.trf.xlu2 }
 0x22c   :  { %873 = vmatmul.msk.f32.vlgmr.msrb.gmra.mxu1 %vm291_vm1, %v394_v51 }
 0x22f   :  { %v425_v52 = vpop.trf.xlu0 }
 0x230   :  { %888 = vmatmul.msk.f32.vlgmr.msrb.gmra.mxu3 %vm291_vm1, %v425_v52 }
 0x233   :  { %v395_v53 = vpop.trf.xlu2 }
 0x234   :  { %874 = vmatmul.msk.f32.gmra.mxu1 %vm291_vm1, %v395_v53 }
 0x237   :  { %v426_v54 = vpop.trf.xlu0 }
 0x238   :  { %889 = vmatmul.msk.f32.gmra.mxu3 %vm291_vm1, %v426_v54 }
 0x23b   :  { %v396_v55 = vpop.trf.xlu2 }
 0x23c   :  { %875 = vmatmul.msk.f32.gmra.mxu1 %vm291_vm1, %v396_v55 }
 0x23f   :  { %v427_v56 = vpop.trf.xlu0 }
 0x240   :  { %890 = vmatmul.msk.f32.gmra.mxu3 %vm291_vm1, %v427_v56 }
 0x243   :  { %v397_v57 = vpop.trf.xlu2 }
 0x244   :  { %876 = vmatmul.msk.f32.vlgmr.msrb.gmra.mxu2 %vm291_vm1, %v397_v57 }
 0x247   :  { %v428_v58 = vpop.trf.xlu0 }
 0x248   :  { %891 = vmatmul.msk.f32.gmra.mxu3 %vm291_vm1, %v428_v58 }
 0x24b   :  { %v398_v59 = vpop.trf.xlu2 }
 0x24c   :  { %877 = vmatmul.msk.f32.gmra.mxu2 %vm291_vm1, %v398_v59 }
 0x24f   :  { %v429_v60 = vpop.trf.xlu0 }
 0x250   :  { %892 = vmatmul.msk.f32.gmra.mxu3 %vm291_vm1, %v429_v60 }
 0x253   :  { %v399_v61 = vpop.trf.xlu2 }
 0x254   :  { %878 = vmatmul.msk.f32.gmra.mxu2 %vm291_vm1, %v399_v61 }
 0x257   :  { %v430_v62 = vpop.trf.xlu0 }
 0x258   :  { %893 = vmatmul.msk.f32.gmra.mxu3 %vm291_vm1, %v430_v62 }
 0x25b   :  { %v400_v63 = vpop.trf.xlu2 }
 0x25c   :  { %879 = vmatmul.msk.f32.gmra.mxu2 %vm291_vm1, %v400_v63 }
 0x25f   :  { %v431_v0 = vpop.trf.xlu0 }
 0x260   :  { %894 = vmatmul.msk.f32.gmra.mxu3 %vm291_vm1, %v431_v0 }
 0x263   :  { %v401_v1 = vpop.trf.xlu2 }
 0x264   :  { %880 = vmatmul.msk.f32.gmra.mxu2 %vm291_vm1, %v401_v1 }
 0x267   :  { %v432_v2 = vpop.trf.xlu0 }
 0x268   :  { %895 = vmatmul.msk.f32.gmra.mxu3 %vm291_vm1, %v432_v2 }
 0x26b   :  { %v402_v3 = vpop.trf.xlu2 }
 0x26c   :  { %881 = vmatmul.msk.f32.gmra.mxu2 %vm291_vm1, %v402_v3 }
 0x26f   :  { %v433_v4 = vpop.trf.xlu0 }
 0x270   :  { %896 = vmatmul.msk.f32.gmra.mxu3 %vm291_vm1, %v433_v4 }
 0x273   :  { %v403_v5 = vpop.trf.xlu2 }
 0x274   :  { %882 = vmatmul.msk.f32.gmra.mxu2 %vm291_vm1, %v403_v5 }
 0x277   :  { %v434_v6 = vpop.trf.xlu0 }
 0x278   :  { %897 = vmatmul.msk.f32.gmra.mxu3 %vm291_vm1, %v434_v6 }
 0x27b   :  { %v404_v7 = vpop.trf.xlu2 }
 0x27c   :  { %883 = vmatmul.msk.f32.gmra.mxu2 %vm291_vm1, %v404_v7 }
 0x27f   :  { %v435_v9 = vpop.trf.xlu0 }
 0x280   :  { %898 = vmatmul.msk.f32.gmra.mxu3 %vm291_vm1, %v435_v9 }
 0x281   :  { %v553_v10 = vpop.f32.mrf.mxu0 }
 0x282   :  { %v554_v11 = vadd.f32 %v1184_v8, %v553_v10 }
 0x284   :  { %650 = vst.msk [vmem:[#allocation2] sm:$0xff] %vm649_vm2, %v554_v11  ;;  %884 = vmatmul.msk.f32.gmra.mxu2 %vm291_vm1, %v421_v44 }
 0x287   :  { %v436_v12 = vpop.trf.xlu0 }
 0x288   :  { %899 = vmatmul.msk.f32.gmra.mxu3 %vm291_vm1, %v436_v12 }
 0x289   :  { %v556_v13 = vpop.f32.mrf.mxu0 }
 0x28a   :  { %v557_v14 = vadd.f32 %v1184_v8, %v556_v13 }
 0x28b   :  { %v760_v15 = vld [vmem:[#allocation2] sm:$0xff] }
 0x28c   :  { %761 = vst [vmem:[%s1327_s7] sm:$0xff] %v760_v15  ;;  %885 = vmatmul.msk.f32.gmra.mxu2 %vm291_vm1, %v1152_v46 }
 0x28d   :  { %651 = vst.msk [vmem:[#allocation2 + $0x8] sm:$0xff] %vm649_vm2, %v557_v14 }
 0x291   :  { %v559_v16 = vpop.f32.mrf.mxu0 }
 0x292   :  { %v560_v17 = vadd.f32 %v1184_v8, %v559_v16 }
 0x294   :  { %v762_v18 = vld [vmem:[#allocation2 + $0x8] sm:$0xff]  ;;  %652 = vst.msk [vmem:[#allocation2 + $0x10] sm:$0xff] %vm649_vm2, %v560_v17  ;;  %886 = vmatmul.msk.f32.gmra.mxu2 %vm291_vm1, %v1155_v48 }
 0x295   :  { %763 = vst [vmem:[%s1327_s7 + $0x8] sm:$0xff] %v762_v18 }
 0x299   :  { %v562_v19 = vpop.f32.mrf.mxu0 }
 0x29a   :  { %v563_v20 = vadd.f32 %v1184_v8, %v562_v19 }
 0x29b   :  { %v764_v21 = vld [vmem:[#allocation2 + $0x10] sm:$0xff] }
 0x29c   :  { %765 = vst [vmem:[%s1327_s7 + $0x10] sm:$0xff] %v764_v21  ;;  %887 = vmatmul.msk.f32.gmra.mxu2 %vm291_vm1, %v1158_v50 }
 0x29d   :  { %653 = vst.msk [vmem:[#allocation2 + $0x18] sm:$0xff] %vm649_vm2, %v563_v20 }
 0x2a1   :  { %v565_v22 = vpop.f32.mrf.mxu0 }
 0x2a2   :  { %v566_v23 = vadd.f32 %v1184_v8, %v565_v22 }
 0x2a4   :  { %v766_v24 = vld [vmem:[#allocation2 + $0x18] sm:$0xff]  ;;  %654 = vst.msk [vmem:[#allocation2 + $0x20] sm:$0xff] %vm649_vm2, %v566_v23 }
 0x2a5   :  { %767 = vst [vmem:[%s1327_s7 + $0x18] sm:$0xff] %v766_v24 }
 0x2a9   :  { %v568_v25 = vpop.f32.mrf.mxu1 }
 0x2aa   :  { %v569_v26 = vadd.f32 %v1184_v8, %v568_v25 }
 0x2ab   :  { %v768_v27 = vld [vmem:[#allocation2 + $0x20] sm:$0xff] }
 0x2ac   :  { %769 = vst [vmem:[%s1327_s7 + $0x20] sm:$0xff] %v768_v27 }
 0x2ad   :  { %655 = vst.msk [vmem:[#allocation2 + $0x28] sm:$0xff] %vm649_vm2, %v569_v26 }
 0x2b1   :  { %v571_v28 = vpop.f32.mrf.mxu1 }
 0x2b2   :  { %v572_v29 = vadd.f32 %v1184_v8, %v571_v28 }
 0x2b3   :  { %v613_v30 = vpop.f32.mrf.mxu3 }
 0x2b4   :  { %v614_v31 = vadd.f32 %v1184_v8, %v613_v30  ;;  %v770_v32 = vld [vmem:[#allocation2 + $0x28] sm:$0xff]  ;;  %656 = vst.msk [vmem:[#allocation2 + $0x30] sm:$0xff] %vm649_vm2, %v572_v29 }
 0x2b5   :  { %771 = vst [vmem:[%s1327_s7 + $0x28] sm:$0xff] %v770_v32 }
 0x2b6   :  { %670 = vst.msk [vmem:[#allocation2 + $0xa0] sm:$0xff] %vm649_vm2, %v614_v31 }
 0x2b9   :  { %v574_v33 = vpop.f32.mrf.mxu1 }
 0x2ba   :  { %v575_v34 = vadd.f32 %v1184_v8, %v574_v33 }
 0x2bb   :  { %v616_v35 = vpop.f32.mrf.mxu3  ;;  %v772_v36 = vld [vmem:[#allocation2 + $0x30] sm:$0xff] }
 0x2bc   :  { %v617_v37 = vadd.f32 %v1184_v8, %v616_v35  ;;  %773 = vst [vmem:[%s1327_s7 + $0x30] sm:$0xff] %v772_v36 }
 0x2bd   :  { %657 = vst.msk [vmem:[#allocation2 + $0x38] sm:$0xff] %vm649_vm2, %v575_v34  ;;  %v800_v38 = vld [vmem:[#allocation2 + $0xa0] sm:$0xff] }
 0x2be   :  { %801 = vst [vmem:[%s1327_s7 + $0xa0] sm:$0xff] %v800_v38 }
 0x2bf   :  { %671 = vst.msk [vmem:[#allocation2 + $0xa8] sm:$0xff] %vm649_vm2, %v617_v37 }
 0x2c3   :  { %v619_v39 = vpop.f32.mrf.mxu3 }
 0x2c4   :  { %v620_v40 = vadd.f32 %v1184_v8, %v619_v39  ;;  %v774_v41 = vld [vmem:[#allocation2 + $0x38] sm:$0xff] }
 0x2c5   :  { %775 = vst [vmem:[%s1327_s7 + $0x38] sm:$0xff] %v774_v41 }
 0x2c6   :  { %v802_v42 = vld [vmem:[#allocation2 + $0xa8] sm:$0xff]  ;;  %672 = vst.msk [vmem:[#allocation2 + $0xb0] sm:$0xff] %vm649_vm2, %v620_v40 }
 0x2c7   :  { %v577_v43 = vpop.f32.mrf.mxu2  ;;  %803 = vst [vmem:[%s1327_s7 + $0xa8] sm:$0xff] %v802_v42 }
 0x2c8   :  { %v578_v44 = vadd.f32 %v1184_v8, %v577_v43 }
 0x2ca   :  { %658 = vst.msk [vmem:[#allocation2 + $0x40] sm:$0xff] %vm649_vm2, %v578_v44 }
 0x2cb   :  { %v622_v45 = vpop.f32.mrf.mxu3 }
 0x2cc   :  { %v623_v46 = vadd.f32 %v1184_v8, %v622_v45 }
 0x2cd   :  { %v804_v47 = vld [vmem:[#allocation2 + $0xb0] sm:$0xff] }
 0x2ce   :  { %673 = vst.msk [vmem:[#allocation2 + $0xb8] sm:$0xff] %vm649_vm2, %v623_v46 }
 0x2cf   :  { %805 = vst [vmem:[%s1327_s7 + $0xb0] sm:$0xff] %v804_v47  ;;  %v580_v48 = vpop.f32.mrf.mxu2 }
 0x2d0   :  { %v581_v49 = vadd.f32 %v1184_v8, %v580_v48 }
 0x2d1   :  { %v776_v50 = vld [vmem:[#allocation2 + $0x40] sm:$0xff] }
 0x2d2   :  { %777 = vst [vmem:[%s1327_s7 + $0x40] sm:$0xff] %v776_v50 }
 0x2d3   :  { %v625_v51 = vpop.f32.mrf.mxu3  ;;  %659 = vst.msk [vmem:[#allocation2 + $0x48] sm:$0xff] %vm649_vm2, %v581_v49 }
 0x2d4   :  { %v626_v52 = vadd.f32 %v1184_v8, %v625_v51 }
 0x2d5   :  { %v806_v53 = vld [vmem:[#allocation2 + $0xb8] sm:$0xff] }
 0x2d6   :  { %807 = vst [vmem:[%s1327_s7 + $0xb8] sm:$0xff] %v806_v53 }
 0x2d7   :  { %674 = vst.msk [vmem:[#allocation2 + $0xc0] sm:$0xff] %vm649_vm2, %v626_v52  ;;  %v583_v54 = vpop.f32.mrf.mxu2 }
 0x2d8   :  { %v584_v55 = vadd.f32 %v1184_v8, %v583_v54 }
 0x2da   :  { %v778_v56 = vld [vmem:[#allocation2 + $0x48] sm:$0xff]  ;;  %660 = vst.msk [vmem:[#allocation2 + $0x50] sm:$0xff] %vm649_vm2, %v584_v55 }
 0x2db   :  { %v628_v57 = vpop.f32.mrf.mxu3  ;;  %779 = vst [vmem:[%s1327_s7 + $0x48] sm:$0xff] %v778_v56 }
 0x2de   :  { %v808_v58 = vld [vmem:[#allocation2 + $0xc0] sm:$0xff] }
 0x2df   :  { %809 = vst [vmem:[%s1327_s7 + $0xc0] sm:$0xff] %v808_v58  ;;  %v586_v59 = vpop.f32.mrf.mxu2 }
 0x2e0   :  { %v587_v60 = vadd.f32 %v1184_v8, %v586_v59 }
 0x2e1   :  { %v780_v61 = vld [vmem:[#allocation2 + $0x50] sm:$0xff] }
 0x2e2   :  { %781 = vst [vmem:[%s1327_s7 + $0x50] sm:$0xff] %v780_v61 }
 0x2e3   :  { %v631_v62 = vpop.f32.mrf.mxu3  ;;  %661 = vst.msk [vmem:[#allocation2 + $0x58] sm:$0xff] %vm649_vm2, %v587_v60 }
 0x2e7   :  { %v589_v63 = vpop.f32.mrf.mxu2 }
 0x2e8   :  { %v590_v0 = vadd.f32 %v1184_v8, %v589_v63 }
 0x2ea   :  { %v782_v1 = vld [vmem:[#allocation2 + $0x58] sm:$0xff]  ;;  %662 = vst.msk [vmem:[#allocation2 + $0x60] sm:$0xff] %vm649_vm2, %v590_v0 }
 0x2eb   :  { %v634_v2 = vpop.f32.mrf.mxu3  ;;  %783 = vst [vmem:[%s1327_s7 + $0x58] sm:$0xff] %v782_v1 }
 0x2ef   :  { %v592_v3 = vpop.f32.mrf.mxu2 }
 0x2f0   :  { %v593_v4 = vadd.f32 %v1184_v8, %v592_v3 }
 0x2f1   :  { %v784_v5 = vld [vmem:[#allocation2 + $0x60] sm:$0xff] }
 0x2f2   :  { %785 = vst [vmem:[%s1327_s7 + $0x60] sm:$0xff] %v784_v5 }
 0x2f3   :  { %v637_v6 = vpop.f32.mrf.mxu3  ;;  %663 = vst.msk [vmem:[#allocation2 + $0x68] sm:$0xff] %vm649_vm2, %v593_v4 }
 0x2f7   :  { %v595_v7 = vpop.f32.mrf.mxu2 }
 0x2f8   :  { %v596_v9 = vadd.f32 %v1184_v8, %v595_v7 }
 0x2fa   :  { %v786_v10 = vld [vmem:[#allocation2 + $0x68] sm:$0xff]  ;;  %664 = vst.msk [vmem:[#allocation2 + $0x70] sm:$0xff] %vm649_vm2, %v596_v9 }
 0x2fb   :  { %v640_v11 = vpop.f32.mrf.mxu3  ;;  %787 = vst [vmem:[%s1327_s7 + $0x68] sm:$0xff] %v786_v10 }
 0x2ff   :  { %v598_v12 = vpop.f32.mrf.mxu2 }
 0x300   :  { %v599_v13 = vadd.f32 %v1184_v8, %v598_v12 }
 0x301   :  { %v788_v14 = vld [vmem:[#allocation2 + $0x70] sm:$0xff] }
 0x302   :  { %789 = vst [vmem:[%s1327_s7 + $0x70] sm:$0xff] %v788_v14 }
 0x303   :  { %v643_v15 = vpop.f32.mrf.mxu3  ;;  %665 = vst.msk [vmem:[#allocation2 + $0x78] sm:$0xff] %vm649_vm2, %v599_v13 }
 0x307   :  { %v601_v16 = vpop.f32.mrf.mxu2 }
 0x308   :  { %v602_v17 = vadd.f32 %v1184_v8, %v601_v16 }
 0x30a   :  { %v790_v18 = vld [vmem:[#allocation2 + $0x78] sm:$0xff]  ;;  %666 = vst.msk [vmem:[#allocation2 + $0x80] sm:$0xff] %vm649_vm2, %v602_v17 }
 0x30b   :  { %v646_v19 = vpop.f32.mrf.mxu3  ;;  %791 = vst [vmem:[%s1327_s7 + $0x78] sm:$0xff] %v790_v18 }
 0x30f   :  { %v604_v20 = vpop.f32.mrf.mxu2 }
 0x310   :  { %v605_v21 = vadd.f32 %v1184_v8, %v604_v20 }
 0x311   :  { %v792_v22 = vld [vmem:[#allocation2 + $0x80] sm:$0xff] }
 0x312   :  { %793 = vst [vmem:[%s1327_s7 + $0x80] sm:$0xff] %v792_v22 }
 0x313   :  { %667 = vst.msk [vmem:[#allocation2 + $0x88] sm:$0xff] %vm649_vm2, %v605_v21 }
 0x317   :  { %v607_v23 = vpop.f32.mrf.mxu2 }
 0x318   :  { %v608_v24 = vadd.f32 %v1184_v8, %v607_v23 }
 0x31a   :  { %v794_v25 = vld [vmem:[#allocation2 + $0x88] sm:$0xff]  ;;  %668 = vst.msk [vmem:[#allocation2 + $0x90] sm:$0xff] %vm649_vm2, %v608_v24 }
 0x31b   :  { %795 = vst [vmem:[%s1327_s7 + $0x88] sm:$0xff] %v794_v25 }
 0x31f   :  { %v610_v26 = vpop.f32.mrf.mxu2 }
 0x320   :  { %v611_v27 = vadd.f32 %v1184_v8, %v610_v26 }
 0x321   :  { %v796_v28 = vld [vmem:[#allocation2 + $0x90] sm:$0xff] }
 0x322   :  { %797 = vst [vmem:[%s1327_s7 + $0x90] sm:$0xff] %v796_v28 }
 0x323   :  { %669 = vst.msk [vmem:[#allocation2 + $0x98] sm:$0xff] %vm649_vm2, %v611_v27 }
 0x32a   :  { %v798_v29 = vld [vmem:[#allocation2 + $0x98] sm:$0xff] }
 0x32b   :  { %799 = vst [vmem:[%s1327_s7 + $0x98] sm:$0xff] %v798_v29 }

</bundles_post_ra>
